<compile_context>
chip_gen: v5e
topology: v5e:2x2
jax: 0.10.0
libtpu: 0.0.40
codegen_flags: <defaults>
</compile_context>

<pallas_src>
import functools

import jax
import jax.numpy as jnp
from jax.experimental import pallas as pl
from jax.experimental.pallas import tpu as pltpu

_LANE = 128


def _cdiv(a, b):
    return -(-a // b)


def _round_up(x, m):
    return _cdiv(x, m) * m


def _sublanes(dtype):
    return {4: 8, 2: 16, 1: 32}.get(jnp.dtype(dtype).itemsize, 8)


_VMEM_LIMIT_CACHE = None


def _default_vmem_limit():
    """~75% of physical VMEM, capped at 96 MiB (v5e/v6e -> 96 MiB, v7x -> 48 MiB)."""
    global _VMEM_LIMIT_CACHE
    if _VMEM_LIMIT_CACHE is None:
        try:
            cap = int(pltpu.get_tpu_info().vmem_capacity_bytes)
        except Exception:
            cap = 64 * 1024 * 1024          # v7x floor — safe on every generation
        _VMEM_LIMIT_CACHE = min((cap * 3) // 4, 96 * 1024 * 1024)
    return _VMEM_LIMIT_CACHE


def _plan_tiles(N, H, O, act_dtype, w_dtype, out_dtype, to_target, budget,
                max_rows_per_tile):
    """Pick (rows_per_tile, num_slots, n_pad, to, o_pad) within the VMEM budget."""
    sub = _sublanes(act_dtype)
    act_b = jnp.dtype(act_dtype).itemsize
    w_b = jnp.dtype(w_dtype).itemsize
    out_b = jnp.dtype(out_dtype).itemsize

    # Output-feature tile: lane-dense multiple of 128; pad O up instead of ever
    # falling back to to == O (which breaks big-vocab heads).
    to = min(_round_up(to_target, _LANE), _round_up(O, _LANE))
    while to > _LANE and 2 * H * to * w_b > budget // 4:
        to = max(_LANE, ((to // 2) // _LANE) * _LANE)
    o_pad = _round_up(O, to)

    fixed = 2 * H * to * w_b + 2 * to * w_b          # dbl-buffered W tile + bias tile

    def vmem_use(rows, slots):
        return fixed + slots * rows * H * act_b + 2 * rows * to * out_b

    n_rows = _round_up(max(N, 1), sub)
    tm_cap = n_rows
    if max_rows_per_tile is not None:
        tm_cap = min(tm_cap, max(sub, (max_rows_per_tile // sub) * sub))

    if tm_cap == n_rows and vmem_use(n_rows, 1) <= budget:
        tm = n_rows                                   # all rows resident; W streams once
    else:
        per_row = 2 * H * act_b + 2 * to * out_b      # 2 gather slots + 2 out buffers
        tm_fit = max(sub, ((budget - fixed) // per_row // sub) * sub)
        tm_fit = min(tm_fit, tm_cap)
        n_tiles = _cdiv(n_rows, tm_fit)
        tm = min(tm_fit, _round_up(_cdiv(n_rows, n_tiles), sub))   # balanced tiles

    n_pad = _round_up(max(N, 1), tm)
    num_slots = 1 if n_pad // tm == 1 else 2
    return tm, num_slots, n_pad, to, o_pad


def mlm_kernel(pos_ref, seq_hbm, w_ref, b_ref, out_ref, x_buf, copy_sem, *,
               rows_per_tile, num_slots, num_row_tiles):
    # pos_ref : SMEM (n_pad,) int32     — flattened, clamped row ids into (B*S, H)
    # seq_hbm : HBM  (B*S, H)           — full sequence output, never copied whole
    # w_ref   : VMEM (H, to)            — weight tile (stored as W^T)
    # b_ref   : VMEM (1, to)            — bias tile
    # out_ref : VMEM (tm, to)           — output tile
    # x_buf   : VMEM (num_slots*tm, H)  — gathered rows (1 slot: fully resident;
    #                                     2 slots: double-buffered prefetch)
    # copy_sem: DMA semaphore shared by all row-gather copies
    i = pl.program_id(0)          # row-tile index over gathered MLM rows
    j = pl.program_id(1)          # output-feature tile index
    tm = rows_per_tile

    def issue_gather(tile_idx, slot):
        base = tile_idx * tm
        dst_base = slot * tm

        # 8 DMA descriptors per loop body so descriptor issue packs the
        # scalar / misc slots.
        @pl.loop(0, tm // 8)
        def _start(c):
            r0 = c * 8
            for u in range(8):
                r = r0 + u
                row = pos_ref[base + r]
                pltpu.make_async_copy(
                    seq_hbm.at[pl.ds(row, 1), :],
                    x_buf.at[pl.ds(dst_base + r, 1), :],
                    copy_sem).start()

    def wait_gather():
        # Every row copy is (1, H): a constant shape-matching descriptor on the
        # shared semaphore consumes the completions — no pos_ref re-reads or
        # per-row address math on the wait path.
        @pl.loop(0, tm)
        def _wait(_):
            pltpu.make_async_copy(
                seq_hbm.at[pl.ds(0, 1), :],
                x_buf.at[pl.ds(0, 1), :],
                copy_sem).wait()

    slot = (i % num_slots) if num_slots > 1 else 0

    @pl.when(j == 0)
    def _gather():
        if num_row_tiles > 1:
            # Row tile 0 had no earlier step to prefetch it: issue inline.
            @pl.when(i == 0)
            def _():
                issue_gather(0, 0)

            wait_gather()

            # Prefetch the next row tile's gather into the other slot right
            # away, so it hides under all of this tile's matmuls.
            @pl.when(i + 1 < num_row_tiles)
            def _():
                issue_gather(i + 1, (i + 1) % num_slots)
        else:
            issue_gather(0, 0)
            wait_gather()

    row_base = slot * tm
    if num_slots > 1:
        row_base = pl.multiple_of(row_base, 8)
    x = x_buf[pl.ds(row_base, tm), :]

    # (tm, H) @ (H, to) on the MXU; f32 accumulation, native-dtype inputs.
    acc = jnp.dot(x, w_ref[...], preferred_element_type=jnp.float32)
    out_ref[...] = (acc + b_ref[...].astype(jnp.float32)).astype(out_ref.dtype)


@functools.partial(jax.jit, static_argnames=("to_target", "vmem_limit_bytes",
                                             "max_rows_per_tile"))
def masked_language_model(sequence_output, mlm_positions, w, bias, *,
                          to_target=512, vmem_limit_bytes=None,
                          max_rows_per_tile=None):
    """sequence_output: (B,S,H); mlm_positions: (B,P) int; w: (H,O) == W^T; bias: (O,)."""
    B, S, H = sequence_output.shape
    P = mlm_positions.shape[1]
    O = w.shape[1]
    N = B * P

    act_dtype = sequence_output.dtype
    out_dtype = act_dtype

    if vmem_limit_bytes is None:
        vmem_limit_bytes = _default_vmem_limit()
    plan_budget = (int(vmem_limit_bytes) * 7) // 8      # headroom for internal scratch

    tm, num_slots, n_pad, to, o_pad = _plan_tiles(
        N, H, O, act_dtype, w.dtype, out_dtype, to_target, plan_budget,
        max_rows_per_tile)
    n_row_tiles = n_pad // tm
    n_o_tiles = o_pad // to

    # Flatten positions exactly like the PyTorch module; clamp so padded / bad
    # positions can never read out of bounds (torch would raise; we clamp).
    flat_pos = (mlm_positions.astype(jnp.int32)
                + (jnp.arange(B, dtype=jnp.int32) * S)[:, None]).reshape(-1)
    flat_pos = jnp.clip(flat_pos, 0, B * S - 1)
    if n_pad != N:
        flat_pos = jnp.concatenate(
            [flat_pos, jnp.zeros((n_pad - N,), jnp.int32)])

    seq_flat = sequence_output.reshape(B * S, H)
    w_p = w if o_pad == O else jnp.pad(w, ((0, 0), (0, o_pad - O)))
    b_p = bias if o_pad == O else jnp.pad(bias, ((0, o_pad - O),))
    bias2d = b_p.reshape(1, o_pad)

    act_bytes = jnp.dtype(act_dtype).itemsize
    w_bytes = jnp.dtype(w.dtype).itemsize
    cost = pl.CostEstimate(
        flops=2 * n_pad * H * o_pad,
        transcendentals=0,
        bytes_accessed=(n_pad * H * act_bytes                    # row gather
                        + n_row_tiles * H * o_pad * w_bytes      # actual weight passes
                        + o_pad * w_bytes                        # bias
                        + n_pad * o_pad * act_bytes),            # output
    )

    kernel = functools.partial(mlm_kernel, rows_per_tile=tm,
                               num_slots=num_slots, num_row_tiles=n_row_tiles)

    out = pl.pallas_call(
        kernel,
        out_shape=jax.ShapeDtypeStruct((n_pad, o_pad), out_dtype),
        grid_spec=pltpu.PrefetchScalarGridSpec(
            num_scalar_prefetch=1,                              # flat_pos -> SMEM
            grid=(n_row_tiles, n_o_tiles),
            in_specs=[
                pl.BlockSpec(memory_space=pl.ANY),                  # seq stays in HBM
                pl.BlockSpec((H, to), lambda i, j, pos: (0, j)),    # weight tile
                pl.BlockSpec((1, to), lambda i, j, pos: (0, j)),    # bias tile
            ],
            out_specs=pl.BlockSpec((tm, to), lambda i, j, pos: (i, j)),
            scratch_shapes=[
                pltpu.VMEM((num_slots * tm, H), act_dtype),         # gathered rows
                pltpu.SemaphoreType.DMA,                            # gather semaphore
            ],
        ),
        compiler_params=pltpu.CompilerParams(
            # Both axes "arbitrary": the gather at j == 0 and the cross-row-tile
            # prefetch rely on one core walking the grid in order (near-zero
            # cost on single-TC v5e/v6e).
            # TODO(synk): v7x megacore would need the O axis sharded across the
            # 2 TCs plus a per-core gather gate; left out to keep x_buf reuse safe.
            dimension_semantics=("arbitrary", "arbitrary"),
            vmem_limit_bytes=int(vmem_limit_bytes),
        ),
        cost_estimate=cost,
    )(flat_pos, seq_flat, w_p, bias2d)

    # Match PyTorch: (batch * num_mlm_positions, output_size)
    return out[:N, :O]


if __name__ == "__main__":
    # Small shapes consistent with the module: batch=2, seq=16, hidden=32,
    # output_size=256, 8 masked positions per batch element.
    B, S, H, O, P = 2, 16, 32, 256, 8

    key = jax.random.PRNGKey(0)
    k_seq, k_pos, k_w, k_b = jax.random.split(key, 4)

    sequence_output = jax.random.normal(k_seq, (B, S, H), dtype=jnp.float32)
    mlm_positions = jax.random.randint(k_pos, (B, P), 0, S, dtype=jnp.int32)

    # Deterministic nn.Linear(hidden_size, output_size) init (uniform +-1/sqrt(H)).
    bound = 1.0 / jnp.sqrt(jnp.float32(H))
    w = jax.random.uniform(k_w, (H, O), jnp.float32, -bound, bound)   # (H, O) = W^T
    bias = jax.random.uniform(k_b, (O,), jnp.float32, -bound, bound)

    # Pure-JAX reference (mirrors the PyTorch forward exactly).
    flat = sequence_output.reshape(-1, H)
    flat_idx = (mlm_positions + (jnp.arange(B) * S)[:, None]).reshape(-1)
    ref = flat[flat_idx] @ w + bias

    # 1) Default plan: all rows resident in VMEM, one weight pass, lane-dense O tile.
    out = jax.block_until_ready(
        masked_language_model(sequence_output, mlm_positions, w, bias))
    assert out.shape == (B * P, O)
    assert jnp.allclose(out, ref, atol=1e-5, rtol=1e-5)

    # 2) bfloat16 end-to-end (native MXU dtype; f32 accumulation inside the kernel).
    out_bf16 = jax.block_until_ready(
        masked_language_model(sequence_output.astype(jnp.bfloat16), mlm_positions,
                              w.astype(jnp.bfloat16), bias.astype(jnp.bfloat16)))
    assert out_bf16.shape == (B * P, O)
    assert out_bf16.dtype == jnp.bfloat16
    assert jnp.allclose(out_bf16.astype(jnp.float32), ref, atol=5e-2, rtol=5e-2)

    # 3) Forced multi-row-tile config (2 row tiles x 2 O tiles): exercises the
    #    double-buffered gather-prefetch path.
    out_mt = jax.block_until_ready(
        masked_language_model(sequence_output, mlm_positions, w, bias,
                              to_target=128, max_rows_per_tile=8))
    assert out_mt.shape == (B * P, O)
    assert jnp.allclose(out_mt, ref, atol=1e-5, rtol=1e-5)

    # 4) Non-128-multiple output size: exercises the O-padding path
    #    (the old `to = O` fallback is gone).
    O2 = 200
    w2, bias2 = w[:, :O2], bias[:O2]
    ref2 = flat[flat_idx] @ w2 + bias2
    out2 = jax.block_until_ready(
        masked_language_model(sequence_output, mlm_positions, w2, bias2))
    assert out2.shape == (B * P, O2)
    assert jnp.allclose(out2, ref2, atol=1e-5, rtol=1e-5)

    print("KERNEL_OK")
</pallas_src>

<mosaic_0001>
module attributes {stable_mosaic.version = 11 : i64} {
  func.func @mlm_kernel(%arg0: i32, %arg1: i32, %arg2: memref<16xi32, #tpu.memory_space<smem>>, %arg3: memref<32x32xf32, #tpu.memory_space<any>>, %arg4: memref<32x256xf32, #tpu.memory_space<vmem>>, %arg5: memref<1x256xf32, #tpu.memory_space<vmem>>, %arg6: memref<16x256xf32, #tpu.memory_space<vmem>>, %arg7: memref<16x32xf32, #tpu.memory_space<vmem>>, %arg8: memref<!tpu.dma_semaphore, #tpu.memory_space<semaphore_mem>>) attributes {dimension_semantics = [#tpu.dimension_semantics<arbitrary>, #tpu.dimension_semantics<arbitrary>], iteration_bounds = array<i64: 1, 1>, scalar_prefetch = 1 : i64, scratch_operands = 2 : i64, tpu.core_type = #tpu.core_type<tc>, window_params = [{}, {transform_indices = @transform_1, window_bounds = array<i64: 32, 256>}, {transform_indices = @transform_2, window_bounds = array<i64: 1, 256>}, {transform_indices = @transform_3, window_bounds = array<i64: 16, 256>}]} {
    %c0_i32 = arith.constant 0 : i32
    %0 = arith.cmpi eq, %arg1, %c0_i32 : i32
    %1 = arith.extui %0 : i1 to i32
    %c0_i32_0 = arith.constant 0 : i32
    %2 = arith.cmpi ne, %1, %c0_i32_0 : i32
    scf.if %2 {
      %c0_i32_8 = arith.constant 0 : i32
      %c2_i32 = arith.constant 2 : i32
      %10 = arith.addi %c0_i32_8, %c2_i32 : i32
      %c1_i32 = arith.constant 1 : i32
      scf.for %arg9 = %c0_i32_8 to %10 step %c1_i32  : i32 {
        %c1_i32_12 = arith.constant 1 : i32
        %12 = arith.muli %arg9, %c1_i32_12 : i32
        %c0_i32_13 = arith.constant 0 : i32
        %13 = arith.addi %c0_i32_13, %12 : i32
        %c8_i32 = arith.constant 8 : i32
        %14 = arith.muli %13, %c8_i32 : i32
        %c0_i32_14 = arith.constant 0 : i32
        %15 = arith.addi %14, %c0_i32_14 : i32
        %c0_i32_15 = arith.constant 0 : i32
        %16 = arith.addi %c0_i32_15, %15 : i32
        %17 = arith.index_cast %16 : i32 to index
        %18 = memref.load %arg2[%17] : memref<16xi32, #tpu.memory_space<smem>>
        %c0_i32_16 = arith.constant 0 : i32
        %19 = arith.addi %c0_i32_16, %15 : i32
        %c0_i32_17 = arith.constant 0 : i32
        %20 = tpu.memref_slice %arg3[%18, %c0_i32_17] : memref<32x32xf32, #tpu.memory_space<any>> -> memref<1x32xf32, #tpu.memory_space<any>>
        %c0_i32_18 = arith.constant 0 : i32
        %21 = tpu.memref_slice %arg7[%19, %c0_i32_18] : memref<16x32xf32, #tpu.memory_space<vmem>> -> memref<1x32xf32, #tpu.memory_space<vmem>>
        tpu.enqueue_dma source(%20 : memref<1x32xf32, #tpu.memory_space<any>>) target(%21 : memref<1x32xf32, #tpu.memory_space<vmem>>) target_semaphore(%arg8 : memref<!tpu.dma_semaphore, #tpu.memory_space<semaphore_mem>>)
        %c1_i32_19 = arith.constant 1 : i32
        %22 = arith.addi %14, %c1_i32_19 : i32
        %c0_i32_20 = arith.constant 0 : i32
        %23 = arith.addi %c0_i32_20, %22 : i32
        %24 = arith.index_cast %23 : i32 to index
        %25 = memref.load %arg2[%24] : memref<16xi32, #tpu.memory_space<smem>>
        %c0_i32_21 = arith.constant 0 : i32
        %26 = arith.addi %c0_i32_21, %22 : i32
        %c0_i32_22 = arith.constant 0 : i32
        %27 = tpu.memref_slice %arg3[%25, %c0_i32_22] : memref<32x32xf32, #tpu.memory_space<any>> -> memref<1x32xf32, #tpu.memory_space<any>>
        %c0_i32_23 = arith.constant 0 : i32
        %28 = tpu.memref_slice %arg7[%26, %c0_i32_23] : memref<16x32xf32, #tpu.memory_space<vmem>> -> memref<1x32xf32, #tpu.memory_space<vmem>>
        tpu.enqueue_dma source(%27 : memref<1x32xf32, #tpu.memory_space<any>>) target(%28 : memref<1x32xf32, #tpu.memory_space<vmem>>) target_semaphore(%arg8 : memref<!tpu.dma_semaphore, #tpu.memory_space<semaphore_mem>>)
        %c2_i32_24 = arith.constant 2 : i32
        %29 = arith.addi %14, %c2_i32_24 : i32
        %c0_i32_25 = arith.constant 0 : i32
        %30 = arith.addi %c0_i32_25, %29 : i32
        %31 = arith.index_cast %30 : i32 to index
        %32 = memref.load %arg2[%31] : memref<16xi32, #tpu.memory_space<smem>>
        %c0_i32_26 = arith.constant 0 : i32
        %33 = arith.addi %c0_i32_26, %29 : i32
        %c0_i32_27 = arith.constant 0 : i32
        %34 = tpu.memref_slice %arg3[%32, %c0_i32_27] : memref<32x32xf32, #tpu.memory_space<any>> -> memref<1x32xf32, #tpu.memory_space<any>>
        %c0_i32_28 = arith.constant 0 : i32
        %35 = tpu.memref_slice %arg7[%33, %c0_i32_28] : memref<16x32xf32, #tpu.memory_space<vmem>> -> memref<1x32xf32, #tpu.memory_space<vmem>>
        tpu.enqueue_dma source(%34 : memref<1x32xf32, #tpu.memory_space<any>>) target(%35 : memref<1x32xf32, #tpu.memory_space<vmem>>) target_semaphore(%arg8 : memref<!tpu.dma_semaphore, #tpu.memory_space<semaphore_mem>>)
        %c3_i32 = arith.constant 3 : i32
        %36 = arith.addi %14, %c3_i32 : i32
        %c0_i32_29 = arith.constant 0 : i32
        %37 = arith.addi %c0_i32_29, %36 : i32
        %38 = arith.index_cast %37 : i32 to index
        %39 = memref.load %arg2[%38] : memref<16xi32, #tpu.memory_space<smem>>
        %c0_i32_30 = arith.constant 0 : i32
        %40 = arith.addi %c0_i32_30, %36 : i32
        %c0_i32_31 = arith.constant 0 : i32
        %41 = tpu.memref_slice %arg3[%39, %c0_i32_31] : memref<32x32xf32, #tpu.memory_space<any>> -> memref<1x32xf32, #tpu.memory_space<any>>
        %c0_i32_32 = arith.constant 0 : i32
        %42 = tpu.memref_slice %arg7[%40, %c0_i32_32] : memref<16x32xf32, #tpu.memory_space<vmem>> -> memref<1x32xf32, #tpu.memory_space<vmem>>
        tpu.enqueue_dma source(%41 : memref<1x32xf32, #tpu.memory_space<any>>) target(%42 : memref<1x32xf32, #tpu.memory_space<vmem>>) target_semaphore(%arg8 : memref<!tpu.dma_semaphore, #tpu.memory_space<semaphore_mem>>)
        %c4_i32 = arith.constant 4 : i32
        %43 = arith.addi %14, %c4_i32 : i32
        %c0_i32_33 = arith.constant 0 : i32
        %44 = arith.addi %c0_i32_33, %43 : i32
        %45 = arith.index_cast %44 : i32 to index
        %46 = memref.load %arg2[%45] : memref<16xi32, #tpu.memory_space<smem>>
        %c0_i32_34 = arith.constant 0 : i32
        %47 = arith.addi %c0_i32_34, %43 : i32
        %c0_i32_35 = arith.constant 0 : i32
        %48 = tpu.memref_slice %arg3[%46, %c0_i32_35] : memref<32x32xf32, #tpu.memory_space<any>> -> memref<1x32xf32, #tpu.memory_space<any>>
        %c0_i32_36 = arith.constant 0 : i32
        %49 = tpu.memref_slice %arg7[%47, %c0_i32_36] : memref<16x32xf32, #tpu.memory_space<vmem>> -> memref<1x32xf32, #tpu.memory_space<vmem>>
        tpu.enqueue_dma source(%48 : memref<1x32xf32, #tpu.memory_space<any>>) target(%49 : memref<1x32xf32, #tpu.memory_space<vmem>>) target_semaphore(%arg8 : memref<!tpu.dma_semaphore, #tpu.memory_space<semaphore_mem>>)
        %c5_i32 = arith.constant 5 : i32
        %50 = arith.addi %14, %c5_i32 : i32
        %c0_i32_37 = arith.constant 0 : i32
        %51 = arith.addi %c0_i32_37, %50 : i32
        %52 = arith.index_cast %51 : i32 to index
        %53 = memref.load %arg2[%52] : memref<16xi32, #tpu.memory_space<smem>>
        %c0_i32_38 = arith.constant 0 : i32
        %54 = arith.addi %c0_i32_38, %50 : i32
        %c0_i32_39 = arith.constant 0 : i32
        %55 = tpu.memref_slice %arg3[%53, %c0_i32_39] : memref<32x32xf32, #tpu.memory_space<any>> -> memref<1x32xf32, #tpu.memory_space<any>>
        %c0_i32_40 = arith.constant 0 : i32
        %56 = tpu.memref_slice %arg7[%54, %c0_i32_40] : memref<16x32xf32, #tpu.memory_space<vmem>> -> memref<1x32xf32, #tpu.memory_space<vmem>>
        tpu.enqueue_dma source(%55 : memref<1x32xf32, #tpu.memory_space<any>>) target(%56 : memref<1x32xf32, #tpu.memory_space<vmem>>) target_semaphore(%arg8 : memref<!tpu.dma_semaphore, #tpu.memory_space<semaphore_mem>>)
        %c6_i32 = arith.constant 6 : i32
        %57 = arith.addi %14, %c6_i32 : i32
        %c0_i32_41 = arith.constant 0 : i32
        %58 = arith.addi %c0_i32_41, %57 : i32
        %59 = arith.index_cast %58 : i32 to index
        %60 = memref.load %arg2[%59] : memref<16xi32, #tpu.memory_space<smem>>
        %c0_i32_42 = arith.constant 0 : i32
        %61 = arith.addi %c0_i32_42, %57 : i32
        %c0_i32_43 = arith.constant 0 : i32
        %62 = tpu.memref_slice %arg3[%60, %c0_i32_43] : memref<32x32xf32, #tpu.memory_space<any>> -> memref<1x32xf32, #tpu.memory_space<any>>
        %c0_i32_44 = arith.constant 0 : i32
        %63 = tpu.memref_slice %arg7[%61, %c0_i32_44] : memref<16x32xf32, #tpu.memory_space<vmem>> -> memref<1x32xf32, #tpu.memory_space<vmem>>
        tpu.enqueue_dma source(%62 : memref<1x32xf32, #tpu.memory_space<any>>) target(%63 : memref<1x32xf32, #tpu.memory_space<vmem>>) target_semaphore(%arg8 : memref<!tpu.dma_semaphore, #tpu.memory_space<semaphore_mem>>)
        %c7_i32 = arith.constant 7 : i32
        %64 = arith.addi %14, %c7_i32 : i32
        %c0_i32_45 = arith.constant 0 : i32
        %65 = arith.addi %c0_i32_45, %64 : i32
        %66 = arith.index_cast %65 : i32 to index
        %67 = memref.load %arg2[%66] : memref<16xi32, #tpu.memory_space<smem>>
        %c0_i32_46 = arith.constant 0 : i32
        %68 = arith.addi %c0_i32_46, %64 : i32
        %c0_i32_47 = arith.constant 0 : i32
        %69 = tpu.memref_slice %arg3[%67, %c0_i32_47] : memref<32x32xf32, #tpu.memory_space<any>> -> memref<1x32xf32, #tpu.memory_space<any>>
        %c0_i32_48 = arith.constant 0 : i32
        %70 = tpu.memref_slice %arg7[%68, %c0_i32_48] : memref<16x32xf32, #tpu.memory_space<vmem>> -> memref<1x32xf32, #tpu.memory_space<vmem>>
        tpu.enqueue_dma source(%69 : memref<1x32xf32, #tpu.memory_space<any>>) target(%70 : memref<1x32xf32, #tpu.memory_space<vmem>>) target_semaphore(%arg8 : memref<!tpu.dma_semaphore, #tpu.memory_space<semaphore_mem>>)
      }
      %c2_i32_9 = arith.constant 2 : i32
      %c0_i32_10 = arith.constant 0 : i32
      %c16_i32 = arith.constant 16 : i32
      %11 = arith.addi %c0_i32_10, %c16_i32 : i32
      %c1_i32_11 = arith.constant 1 : i32
      scf.for %arg9 = %c0_i32_10 to %11 step %c1_i32_11  : i32 {
        %c0_i32_12 = arith.constant 0 : i32
        %c0_i32_13 = arith.constant 0 : i32
        %12 = tpu.memref_slice %arg3[%c0_i32_12, %c0_i32_13] : memref<32x32xf32, #tpu.memory_space<any>> -> memref<1x32xf32, #tpu.memory_space<any>>
        %c0_i32_14 = arith.constant 0 : i32
        %c0_i32_15 = arith.constant 0 : i32
        %13 = tpu.memref_slice %arg7[%c0_i32_14, %c0_i32_15] : memref<16x32xf32, #tpu.memory_space<vmem>> -> memref<1x32xf32, #tpu.memory_space<vmem>>
        tpu.wait_dma2 semaphore(%arg8 : memref<!tpu.dma_semaphore, #tpu.memory_space<semaphore_mem>>) src(%12 : memref<1x32xf32, #tpu.memory_space<any>>) dst(%13 : memref<1x32xf32, #tpu.memory_space<vmem>>)
      }
    } else {
    }
    %c0 = arith.constant 0 : index
    %c0_1 = arith.constant 0 : index
    %3 = vector.load %arg7[%c0, %c0_1] : memref<16x32xf32, #tpu.memory_space<vmem>>, vector<16x32xf32>
    %c0_2 = arith.constant 0 : index
    %c0_3 = arith.constant 0 : index
    %4 = vector.load %arg4[%c0_2, %c0_3] : memref<32x256xf32, #tpu.memory_space<vmem>>, vector<32x256xf32>
    %cst = arith.constant dense<0.000000e+00> : vector<16x256xf32>
    %5 = tpu.matmul %3, %4, %cst {dimension_numbers = #tpu.dot_dimension_numbers<[1], [0], [0], [1], [0, 0, 1, 1], [], []>} : vector<16x32xf32>, vector<32x256xf32>, vector<16x256xf32> -> vector<16x256xf32>
    %c0_4 = arith.constant 0 : index
    %c0_5 = arith.constant 0 : index
    %6 = vector.load %arg5[%c0_4, %c0_5] : memref<1x256xf32, #tpu.memory_space<vmem>>, vector<1x256xf32>
    %7 = vector.broadcast %6 : vector<1x256xf32> to vector<16x256xf32>
    %8 = arith.addf %5, %7 : vector<16x256xf32>
    %c0_6 = arith.constant 0 : index
    %c0_7 = arith.constant 0 : index
    %9 = vector.load %arg6[%c0_6, %c0_7] : memref<16x256xf32, #tpu.memory_space<vmem>>, vector<16x256xf32>
    tpu.vector_store %arg6[%c0_6, %c0_7], %8 {strides = array<i32>} : memref<16x256xf32, #tpu.memory_space<vmem>>, vector<16x256xf32>,
    return
  }
  func.func @transform_1(%arg0: i32, %arg1: i32, %arg2: memref<16xi32, #tpu.memory_space<smem>>) -> (i32, i32) {
    %c0_i32 = arith.constant 0 : i32
    %c0_i32_0 = arith.constant 0 : i32
    return %c0_i32, %arg1 : i32, i32
  }
  func.func @transform_2(%arg0: i32, %arg1: i32, %arg2: memref<16xi32, #tpu.memory_space<smem>>) -> (i32, i32) {
    %c0_i32 = arith.constant 0 : i32
    %c0_i32_0 = arith.constant 0 : i32
    return %c0_i32, %arg1 : i32, i32
  }
  func.func @transform_3(%arg0: i32, %arg1: i32, %arg2: memref<16xi32, #tpu.memory_space<smem>>) -> (i32, i32) {
    %c0_i32 = arith.constant 0 : i32
    return %arg0, %arg1 : i32, i32
  }
}

</mosaic_0001>

<bundles_post_ra>
// kernel: masked_language_model.1
= control target key start
LH: loop header
LB: loop body
LE: loop exit
PB: predicated region body
PF: predicated region fallthrough
CT: control target
= control target key end

     0   :  { %s650_s18 = smov [#allocation5]   ;;  %s867_s0 = inlined_call_operand.vmem [shape: s32[16], index: 0, kind: input, shape index: {}]   ;;  %s868_s1 = inlined_call_operand.hbm [shape: f32[32,32], index: 1, kind: input, shape index: {}]   ;;  %s869_s2 = inlined_call_operand.hbm [shape: f32[32,256], index: 2, kind: input, shape index: {}]   ;;  %s870_s3 = inlined_call_operand.vmem [shape: f32[1,256], index: 3, kind: input, shape index: {}]   ;;  %s871_s4 = inlined_call_operand.hbm [shape: f32[16,256], index: 4, kind: output, shape index: {}]  }
   0x1   :  { %s10_s17 = sshll.u32 %s867_s0, 4  ;;  %s11_s17 = int_to_ptr.vmem [resolvable:$true] %s10_s17 }
   0x2   :  { %13 = dma.vmem_to_smem %s11_s17, 16, %s650_s18, [#allocation4] }
   0x3   :  { %634 = dma.done.wait [#allocation4], 16 }
   0x4   :  { %635 = vsyncadd [#allocation4], 4294967280 }
   0x5   :  { %16 = sfence }
   0x6   :  { %17 = vsyncpa [#allocation7], 0 }
   0x7   :  { %18 = vsyncpa [#allocation8], 0  ;;  %s23_s21 = sshll.u32 %s869_s2, 4  ;;  %s651_s22 = smov [#allocation6]   ;;  %s24_s21 = int_to_ptr.hbm [resolvable:$true] %s23_s21 }
   0x8   :  { %s25_s23 = sshll.u32 %s651_s22, 4  ;;  %s652_s24 = smov 256   ;;  %s26_s23 = int_to_ptr.vmem [resolvable:$true] %s25_s23 }
   0x9   :  { %s653_s25 = smov 16  }
   0xa   :  { %31 = dma.hbm_to_vmem [thread:$0]  %s24_s21, 1024, %s26_s23, [#allocation7], %s652_s24, %s652_s24, %s653_s25  }
   0xb   :  { %636 = dma.done.wait [#allocation7], 1024  }
   0xc   :  { %637 = vsyncadd [#allocation7], 4294966272  ;;  %s690_s0 = smov 0  }
   0xd LB: > { %s696_s2 = sshll.u32 %s644_s0, 3  ;;  %s729_s22 = scalar_lea.hbm %s868_s1, 32  ;;  %s644_s0 = sphi %s690_s0, %s47_s0  }
   0xe   : > { %s49_s26 = sld [smem:[#allocation5 + %s696_s2]]  ;;  %s700_s27 = scalar_lea.vmem [#allocation2], %s696_s2 }
   0xf   : > { %s61_s28 = sshll.u32 %s700_s27, 4  ;;  %s65_s29 = sadd.s32 1, %s696_s2  ;;  %s704_s28 = int_to_ptr.vmem [resolvable:$true] %s61_s28 }
  0x10   : > { %s706_s30 = sld [smem:[#allocation5 + %s65_s29]]  ;;  %s297_s5 = scalar_lea.vmem %s700_s27, 1 [#allocation2] }
  0x11   : > { %s82_s6 = sadd.s32 2, %s696_s2  ;;  %s710_s7 = sshll.u32 %s297_s5, 4  ;;  %s79_s7 = int_to_ptr.vmem [resolvable:$true] %s710_s7 }
  0x12   : > { %s712_s8 = sld [smem:[#allocation5 + %s82_s6]]  ;;  %s301_s9 = scalar_lea.vmem %s700_s27, 2 [#allocation2] }
  0x13   : > { %s719_s13 = sshll.u32 %s301_s9, 4  ;;  %s96_s13 = int_to_ptr.vmem [resolvable:$true] %s719_s13 }
  0x14   : > { %s50_s12 = scalar_lea.hbm %s868_s1, %s49_s26 }
  0x15   : > { %s59_s14 = sshll.u32 %s50_s12, 4  ;;  %s60_s14 = int_to_ptr.hbm [resolvable:$true] %s59_s14 }
  0x16   : > { %s67_s17 = scalar_lea.hbm %s868_s1, %s706_s30  ;;  %s410_s18 = sshra.s32 %s60_s14, 4  ;;  %s411_s18 = int_to_ptr.hbm [resolvable:$true] %s410_s18 }
  0x17   : > { %s412_s19 = scalar_lea.hbm %s411_s18, 1  ;;  %p415_p1 = scmp.lt.s32.totalorder %s411_s18, %s868_s1 }
  0x18   : > { %p413_p0 = scmp.ne.s32.totalorder %s411_s18, %s412_s19  ;;  %p416_p2 = scmp.lt.s32.totalorder %s729_s22, %s412_s19 }
  0x1a   : > { %p417_p3 = por %p416_p2, %p415_p1 }
  0x1c   : > { %p418_p4 = pnand %p417_p3, %p413_p0 }
  0x1e   : > { %421 = shalt.err (!%p418_p4)  }
  0x1f   : > { %s422_s29 = sshra.s32 %s704_s28, 4  ;;  %s654_s5 = smov [#allocation2]   ;;  %s423_s29 = int_to_ptr.vmem [resolvable:$true] %s422_s29 }
  0x20   : > { %s424_s30 = scalar_lea.vmem %s423_s29, 1  ;;  %s736_s6 = scalar_lea.vmem %s654_s5, 16 }
  0x21   : > { %p425_p5 = scmp.ne.s32.totalorder %s423_s29, %s424_s30  ;;  %p427_p6 = scmp.lt.s32.totalorder %s423_s29, [#allocation2] }
  0x22   : > { %p428_p7 = scmp.lt.s32.totalorder %s736_s6, %s424_s30 }
  0x24   : > { %p429_p8 = por %p428_p7, %p427_p6 }
  0x26   : > { %p430_p9 = pnand %p429_p8, %p425_p5 }
  0x28   : > { %433 = shalt.err (!%p430_p9)  }
  0x29   : > { %64 = dma.hbm_to_vmem [thread:$0]  %s60_s14, 16, %s704_s28, [#allocation3] }
  0x2a   : > { %s76_s9 = sshll.u32 %s67_s17, 4  ;;  %s84_s12 = scalar_lea.hbm %s868_s1, %s712_s8  ;;  %s77_s9 = int_to_ptr.hbm [resolvable:$true] %s76_s9 }
  0x2b   : > { %s744_s15 = sshll.u32 %s84_s12, 4  ;;  %s434_s16 = sshra.s32 %s77_s9, 4  ;;  %s435_s16 = int_to_ptr.hbm [resolvable:$true] %s434_s16  ;;  %s94_s15 = int_to_ptr.hbm [resolvable:$true] %s744_s15 }
  0x2c   : > { %s436_s18 = scalar_lea.hbm %s435_s16, 1  ;;  %p439_p11 = scmp.lt.s32.totalorder %s435_s16, %s868_s1 }
  0x2d   : > { %p437_p10 = scmp.ne.s32.totalorder %s435_s16, %s436_s18  ;;  %p440_p12 = scmp.lt.s32.totalorder %s729_s22, %s436_s18 }
  0x2f   : > { %p441_p13 = por %p440_p12, %p439_p11 }
  0x31   : > { %p442_p0 = pnand %p441_p13, %p437_p10 }
  0x33   : > { %445 = shalt.err (!%p442_p0)  }
  0x34   : > { %s446_s28 = sshra.s32 %s79_s7, 4  ;;  %s447_s28 = int_to_ptr.vmem [resolvable:$true] %s446_s28 }
  0x35   : > { %s448_s8 = scalar_lea.vmem %s447_s28, 1  ;;  %p451_p2 = scmp.lt.s32.totalorder %s447_s28, [#allocation2] }
  0x36   : > { %p449_p1 = scmp.ne.s32.totalorder %s447_s28, %s448_s8  ;;  %p452_p3 = scmp.lt.s32.totalorder %s736_s6, %s448_s8 }
  0x38   : > { %p453_p4 = por %p452_p3, %p451_p2 }
  0x3a   : > { %p454_p5 = pnand %p453_p4, %p449_p1 }
  0x3c   : > { %457 = shalt.err (!%p454_p5)  }
  0x3d   : > { %81 = dma.hbm_to_vmem [thread:$0]  %s77_s9, 16, %s79_s7, [#allocation3] }
  0x3e   : > { %s99_s14 = sadd.s32 3, %s696_s2  ;;  %s458_s17 = sshra.s32 %s94_s15, 4  ;;  %s459_s17 = int_to_ptr.hbm [resolvable:$true] %s458_s17 }
  0x3f   : > { %s460_s21 = scalar_lea.hbm %s459_s17, 1  ;;  %p463_p7 = scmp.lt.s32.totalorder %s459_s17, %s868_s1 }
  0x40   : > { %p461_p6 = scmp.ne.s32.totalorder %s459_s17, %s460_s21  ;;  %p464_p8 = scmp.lt.s32.totalorder %s729_s22, %s460_s21 }
  0x42   : > { %p465_p9 = por %p464_p8, %p463_p7 }
  0x44   : > { %p466_p10 = pnand %p465_p9, %p461_p6 }
  0x46   : > { %469 = shalt.err (!%p466_p10)  }
  0x47   : > { %s470_s29 = sshra.s32 %s96_s13, 4  ;;  %s471_s29 = int_to_ptr.vmem [resolvable:$true] %s470_s29 }
  0x48   : > { %s472_s7 = scalar_lea.vmem %s471_s29, 1  ;;  %p475_p12 = scmp.lt.s32.totalorder %s471_s29, [#allocation2] }
  0x49   : > { %p473_p11 = scmp.ne.s32.totalorder %s471_s29, %s472_s7  ;;  %p476_p13 = scmp.lt.s32.totalorder %s736_s6, %s472_s7 }
  0x4b   : > { %p477_p0 = por %p476_p13, %p475_p12 }
  0x4d   : > { %p478_p1 = pnand %p477_p0, %p473_p11 }
  0x4f   : > { %481 = shalt.err (!%p478_p1)  }
  0x50   : > { %98 = dma.hbm_to_vmem [thread:$0]  %s94_s15, 16, %s96_s13, [#allocation3] }
  0x51   : > { %s100_s30 = sld [smem:[#allocation5 + %s99_s14]]  ;;  %s305_s5 = scalar_lea.vmem %s700_s27, 3 [#allocation2] }
  0x52   : > { %s767_s9 = sshll.u32 %s305_s5, 4  ;;  %s116_s10 = sadd.s32 4, %s696_s2  ;;  %s113_s9 = int_to_ptr.vmem [resolvable:$true] %s767_s9 }
  0x53   : > { %s771_s11 = sld [smem:[#allocation5 + %s116_s10]]  ;;  %s309_s12 = scalar_lea.vmem %s700_s27, 4 [#allocation2] }
  0x54   : > { %s133_s16 = sadd.s32 5, %s696_s2  ;;  %s775_s18 = sshll.u32 %s309_s12, 4  ;;  %s130_s18 = int_to_ptr.vmem [resolvable:$true] %s775_s18 }
  0x55   : > { %s777_s19 = sld [smem:[#allocation5 + %s133_s16]]  ;;  %s313_s13 = scalar_lea.vmem %s700_s27, 5 [#allocation2] }
  0x56   : > { %s784_s8 = sshll.u32 %s313_s13, 4  ;;  %s147_s8 = int_to_ptr.vmem [resolvable:$true] %s784_s8 }
  0x57   : > { %s101_s28 = scalar_lea.hbm %s868_s1, %s100_s30 }
  0x58   : > { %s110_s14 = sshll.u32 %s101_s28, 4  ;;  %s111_s14 = int_to_ptr.hbm [resolvable:$true] %s110_s14 }
  0x59   : > { %s118_s23 = scalar_lea.hbm %s868_s1, %s771_s11  ;;  %s482_s26 = sshra.s32 %s111_s14, 4  ;;  %s483_s26 = int_to_ptr.hbm [resolvable:$true] %s482_s26 }
  0x5a   : > { %s484_s29 = scalar_lea.hbm %s483_s26, 1  ;;  %p487_p3 = scmp.lt.s32.totalorder %s483_s26, %s868_s1 }
  0x5b   : > { %p485_p2 = scmp.ne.s32.totalorder %s483_s26, %s484_s29  ;;  %p488_p4 = scmp.lt.s32.totalorder %s729_s22, %s484_s29 }
  0x5d   : > { %p489_p5 = por %p488_p4, %p487_p3 }
  0x5f   : > { %p490_p6 = pnand %p489_p5, %p485_p2 }
  0x61   : > { %493 = shalt.err (!%p490_p6)  }
  0x62   : > { %s494_s30 = sshra.s32 %s113_s9, 4  ;;  %s495_s30 = int_to_ptr.vmem [resolvable:$true] %s494_s30 }
  0x63   : > { %s496_s10 = scalar_lea.vmem %s495_s30, 1  ;;  %p499_p8 = scmp.lt.s32.totalorder %s495_s30, [#allocation2] }
  0x64   : > { %p497_p7 = scmp.ne.s32.totalorder %s495_s30, %s496_s10  ;;  %p500_p9 = scmp.lt.s32.totalorder %s736_s6, %s496_s10 }
  0x66   : > { %p501_p10 = por %p500_p9, %p499_p8 }
  0x68   : > { %p502_p11 = pnand %p501_p10, %p497_p7 }
  0x6a   : > { %505 = shalt.err (!%p502_p11)  }
  0x6b   : > { %115 = dma.hbm_to_vmem [thread:$0]  %s111_s14, 16, %s113_s9, [#allocation3] }
  0x6c   : > { %s127_s11 = sshll.u32 %s118_s23, 4  ;;  %s135_s13 = scalar_lea.hbm %s868_s1, %s777_s19  ;;  %s128_s11 = int_to_ptr.hbm [resolvable:$true] %s127_s11 }
  0x6d   : > { %s804_s15 = sshll.u32 %s135_s13, 4  ;;  %s506_s20 = sshra.s32 %s128_s11, 4  ;;  %s507_s20 = int_to_ptr.hbm [resolvable:$true] %s506_s20  ;;  %s145_s15 = int_to_ptr.hbm [resolvable:$true] %s804_s15 }
  0x6e   : > { %s508_s28 = scalar_lea.hbm %s507_s20, 1  ;;  %p511_p13 = scmp.lt.s32.totalorder %s507_s20, %s868_s1 }
  0x6f   : > { %p509_p12 = scmp.ne.s32.totalorder %s507_s20, %s508_s28  ;;  %p512_p0 = scmp.lt.s32.totalorder %s729_s22, %s508_s28 }
  0x71   : > { %p513_p1 = por %p512_p0, %p511_p13 }
  0x73   : > { %p514_p2 = pnand %p513_p1, %p509_p12 }
  0x75   : > { %517 = shalt.err (!%p514_p2)  }
  0x76   : > { %s518_s9 = sshra.s32 %s130_s18, 4  ;;  %s519_s9 = int_to_ptr.vmem [resolvable:$true] %s518_s9 }
  0x77   : > { %s520_s19 = scalar_lea.vmem %s519_s9, 1  ;;  %p523_p4 = scmp.lt.s32.totalorder %s519_s9, [#allocation2] }
  0x78   : > { %p521_p3 = scmp.ne.s32.totalorder %s519_s9, %s520_s19  ;;  %p524_p5 = scmp.lt.s32.totalorder %s736_s6, %s520_s19 }
  0x7a   : > { %p525_p6 = por %p524_p5, %p523_p4 }
  0x7c   : > { %p526_p7 = pnand %p525_p6, %p521_p3 }
  0x7e   : > { %529 = shalt.err (!%p526_p7)  }
  0x7f   : > { %132 = dma.hbm_to_vmem [thread:$0]  %s128_s11, 16, %s130_s18, [#allocation3] }
  0x80   : > { %s150_s14 = sadd.s32 6, %s696_s2  ;;  %s530_s23 = sshra.s32 %s145_s15, 4  ;;  %s531_s23 = int_to_ptr.hbm [resolvable:$true] %s530_s23 }
  0x81   : > { %s532_s26 = scalar_lea.hbm %s531_s23, 1  ;;  %p535_p9 = scmp.lt.s32.totalorder %s531_s23, %s868_s1 }
  0x82   : > { %p533_p8 = scmp.ne.s32.totalorder %s531_s23, %s532_s26  ;;  %p536_p10 = scmp.lt.s32.totalorder %s729_s22, %s532_s26 }
  0x84   : > { %p537_p11 = por %p536_p10, %p535_p9 }
  0x86   : > { %p538_p12 = pnand %p537_p11, %p533_p8 }
  0x88   : > { %541 = shalt.err (!%p538_p12)  }
  0x89   : > { %s542_s5 = sshra.s32 %s147_s8, 4  ;;  %s543_s5 = int_to_ptr.vmem [resolvable:$true] %s542_s5 }
  0x8a   : > { %s544_s18 = scalar_lea.vmem %s543_s5, 1  ;;  %p547_p0 = scmp.lt.s32.totalorder %s543_s5, [#allocation2] }
  0x8b   : > { %p545_p13 = scmp.ne.s32.totalorder %s543_s5, %s544_s18  ;;  %p548_p1 = scmp.lt.s32.totalorder %s736_s6, %s544_s18 }
  0x8d   : > { %p549_p2 = por %p548_p1, %p547_p0 }
  0x8f   : > { %p550_p3 = pnand %p549_p2, %p545_p13 }
  0x91   : > { %553 = shalt.err (!%p550_p3)  }
  0x92   : > { %149 = dma.hbm_to_vmem [thread:$0]  %s145_s15, 16, %s147_s8, [#allocation3] }
  0x93   : > { %s151_s30 = sld [smem:[#allocation5 + %s150_s14]]  ;;  %s317_s10 = scalar_lea.vmem %s700_s27, 6 [#allocation2] }
  0x94   : > { %s167_s11 = sadd.s32 7, %s696_s2  ;;  %s163_s16 = sshll.u32 %s317_s10, 4  ;;  %s164_s16 = int_to_ptr.vmem [resolvable:$true] %s163_s16 }
  0x95   : > { %s828_s12 = sld [smem:[#allocation5 + %s167_s11]]  ;;  %s321_s13 = scalar_lea.vmem %s700_s27, 7 [#allocation2] }
  0x96   : > { %s831_s20 = sshll.u32 %s321_s13, 4  ;;  %s181_s20 = int_to_ptr.vmem [resolvable:$true] %s831_s20 }
  0x99   : > { %s152_s21 = scalar_lea.hbm %s868_s1, %s151_s30 }
  0x9a   : > { %s161_s9 = sshll.u32 %s152_s21, 4  ;;  %s162_s9 = int_to_ptr.hbm [resolvable:$true] %s161_s9 }
  0x9b   : > { %s169_s2 = scalar_lea.hbm %s868_s1, %s828_s12  ;;  %s554_s19 = sshra.s32 %s162_s9, 4  ;;  %s555_s19 = int_to_ptr.hbm [resolvable:$true] %s554_s19 }
  0x9c   : > { %s556_s14 = scalar_lea.hbm %s555_s19, 1  ;;  %p559_p5 = scmp.lt.s32.totalorder %s555_s19, %s868_s1 }
  0x9d   : > { %p557_p4 = scmp.ne.s32.totalorder %s555_s19, %s556_s14  ;;  %p560_p6 = scmp.lt.s32.totalorder %s729_s22, %s556_s14 }
  0x9f   : > { %p561_p7 = por %p560_p6, %p559_p5 }
  0xa1   : > { %p562_p8 = pnand %p561_p7, %p557_p4 }
  0xa3   : > { %565 = shalt.err (!%p562_p8)  }
  0xa4   : > { %s566_s26 = sshra.s32 %s164_s16, 4  ;;  %s567_s26 = int_to_ptr.vmem [resolvable:$true] %s566_s26 }
  0xa5   : > { %s568_s29 = scalar_lea.vmem %s567_s26, 1  ;;  %p571_p10 = scmp.lt.s32.totalorder %s567_s26, [#allocation2] }
  0xa6   : > { %p569_p9 = scmp.ne.s32.totalorder %s567_s26, %s568_s29  ;;  %p572_p11 = scmp.lt.s32.totalorder %s736_s6, %s568_s29 }
  0xa8   : > { %p573_p12 = por %p572_p11, %p571_p10 }
  0xaa   : > { %p574_p13 = pnand %p573_p12, %p569_p9 }
  0xac   : > { %577 = shalt.err (!%p574_p13)  }
  0xad   : > { %166 = dma.hbm_to_vmem [thread:$0]  %s162_s9, 16, %s164_s16, [#allocation3] }
  0xae   : > { %s178_s7 = sshll.u32 %s169_s2, 4  ;;  %s179_s7 = int_to_ptr.hbm [resolvable:$true] %s178_s7 }
  0xaf   : > { %s578_s5 = sshra.s32 %s179_s7, 4  ;;  %s579_s5 = int_to_ptr.hbm [resolvable:$true] %s578_s5 }
  0xb0   : > { %s580_s18 = scalar_lea.hbm %s579_s5, 1  ;;  %p583_p1 = scmp.lt.s32.totalorder %s579_s5, %s868_s1 }
  0xb1   : > { %p581_p0 = scmp.ne.s32.totalorder %s579_s5, %s580_s18  ;;  %p584_p2 = scmp.lt.s32.totalorder %s729_s22, %s580_s18 }
  0xb3   : > { %p585_p3 = por %p584_p2, %p583_p1 }
  0xb5   : > { %p586_p4 = pnand %p585_p3, %p581_p0 }
  0xb7   : > { %589 = shalt.err (!%p586_p4)  }
  0xb8   : > { %s590_s11 = sshra.s32 %s181_s20, 4  ;;  %s591_s11 = int_to_ptr.vmem [resolvable:$true] %s590_s11 }
  0xb9   : > { %s592_s12 = scalar_lea.vmem %s591_s11, 1  ;;  %p595_p6 = scmp.lt.s32.totalorder %s591_s11, [#allocation2] }
  0xba   : > { %p593_p5 = scmp.ne.s32.totalorder %s591_s11, %s592_s12  ;;  %p596_p7 = scmp.lt.s32.totalorder %s736_s6, %s592_s12 }
  0xbc   : > { %p597_p8 = por %p596_p7, %p595_p6 }
  0xbe   : > { %p598_p9 = pnand %p597_p8, %p593_p5 }
  0xc0   : > { %601 = shalt.err (!%p598_p9)  }
  0xc1   : > { %183 = dma.hbm_to_vmem [thread:$0]  %s179_s7, 16, %s181_s20, [#allocation3] }
  0xc2   : > { %s47_s0 = sadd.s32 1, %s644_s0  }
  0xc3   : > { %p44_p10 = scmp.ge.s32.totalorder %s47_s0, 2  }
  0xc4   :  { %s646_s22 = smov (%p44_p10), 0  }
  0xc5   :  { %46 = sbr.rel (!%p44_p10) target bundleno = 13 (0xd), region = 98 }
  0xca LB: > { %638 = dma.done.wait [#allocation3], 16  ;;  %s648_s22 = sphi %s646_s22, %s189_s22  }
  0xcb   : > { %639 = vsyncadd [#allocation3], 4294967280  ;;  %s189_s22 = sadd.s32 1, %s648_s22  }
  0xcc   : > { %p186_p11 = scmp.ge.s32.totalorder %s189_s22, 16  }
  0xcd   :  { %v201_v0 = vld [vmem:[#allocation6 + $0x30] sm:$0xff] (%p186_p11)  ;;  %v202_v1 = vld [vmem:[#allocation6 + $0x38] sm:$0xff] (%p186_p11)  ;;  %v199_v2 = vld [vmem:[#allocation6 + $0x20] sm:$0xff] (%p186_p11)  ;;  %vm209_vm0 = vcmask (%p186_p11), 261120   ;;  %s655_s6 = smov (%p186_p11), [#allocation9]   ;;  %s272_s28 = sshll.u32 (%p186_p11), %s871_s4, 4  ;;  %s273_s28 = int_to_ptr.hbm [resolvable:$true] %s272_s28 }
  0xce   :  { %188 = sbr.rel (!%p186_p11) target bundleno = 202 (0xca), region = 109  ;;  %345 = vmatpush.msra.mxu2 (%p186_p11), %v201_v0  ;;  %349 = vmatpush.msra.mxu3 (%p186_p11), %v202_v1  ;;  %v200_v3 = vld [vmem:[#allocation6 + $0x28] sm:$0xff] (%p186_p11)  ;;  %v197_v4 = vld [vmem:[#allocation6 + $0x10] sm:$0xff] (%p186_p11)  ;;  %v198_v5 = vld [vmem:[#allocation6 + $0x18] sm:$0xff] (%p186_p11)  ;;  %s270_s16 = sshll.u32 (%p186_p11), %s655_s6, 4  ;;  %s271_s16 = int_to_ptr.vmem [resolvable:$true] %s270_s16 }
  0xcf   :  { %228 = vmatpush.msra.mxu0 (%p186_p11), %v201_v0  ;;  %251 = vmatpush.msra.mxu1 (%p186_p11), %v202_v1  ;;  %v195_v6 = vld [vmem:[#allocation6] sm:$0xff] (%p186_p11)  ;;  %v196_v7 = vld [vmem:[#allocation6 + $0x8] sm:$0xff] (%p186_p11)  ;;  %v194_v8 = vld [vmem:[#allocation2 + $0x8] sm:$0xff] (%p186_p11) }
  0xd0   :  { %346 = vmatpush.msra.mxu2 (%p186_p11), %v199_v2  ;;  %350 = vmatpush.msra.mxu3 (%p186_p11), %v200_v3  ;;  %v193_v9 = vld [vmem:[#allocation2] sm:$0xff] (%p186_p11) }
  0xd1   :  { %229 = vmatpush.msra.mxu0 (%p186_p11), %v199_v2  ;;  %252 = vmatpush.msra.mxu1 (%p186_p11), %v200_v3  ;;  %v203_v10 = vld [vmem:[%s870_s3] sm:$0x3] (%p186_p11) }
  0xd2   :  { %347 = vmatpush.msra.mxu2 (%p186_p11), %v197_v4  ;;  %351 = vmatpush.msra.mxu3 (%p186_p11), %v198_v5  ;;  %v205_v11 = vperm.slane (%p186_p11), %v203_v10, 0  ;;  %v206_v12 = vperm.slane (%p186_p11), %v203_v10, 1 }
  0xd3   :  { %230 = vmatpush.msra.mxu0 %v197_v4  ;;  %253 = vmatpush.msra.mxu1 %v198_v5 }
  0xd4   :  { %348 = vmatpush.msra.mxu2 %v195_v6  ;;  %352 = vmatpush.msra.mxu3 %v196_v7 }
  0xd5   :  { %341 = vmatmul.msk.f32.vlgmr.msra.gmra.mxu2 %vm209_vm0, %v194_v8  ;;  %343 = vmatmul.msk.f32.vlgmr.msra.gmra.mxu3 %vm209_vm0, %v194_v8 }
  0xd6   :  { %231 = vmatpush.msra.mxu0 %v195_v6  ;;  %254 = vmatpush.msra.mxu1 %v196_v7 }
  0xd7   :  { %340 = vmatmul.msk.f32.vlgmr.msra.gmra.mxu0 %vm209_vm0, %v193_v9  ;;  %342 = vmatmul.msk.f32.vlgmr.msra.gmra.mxu1 %vm209_vm0, %v193_v9 }
 0x154   :  { %v233_v13 = vpop.f32.mrf.mxu0  ;;  %v256_v14 = vpop.f32.mrf.mxu1 }
 0x155   :  { %v234_v15 = vadd.f32 %v233_v13, %v205_v11  ;;  %v257_v16 = vadd.f32 %v256_v14, %v206_v12 }
 0x157   :  { %262 = vst [vmem:[#allocation9] sm:$0xff] %v234_v15 }
 0x158   :  { %v236_v17 = vpop.f32.mrf.mxu2  ;;  %263 = vst [vmem:[#allocation9 + $0x8] sm:$0xff] %v257_v16  ;;  %v259_v18 = vpop.f32.mrf.mxu3 }
 0x159   :  { %v237_v19 = vadd.f32 %v236_v17, %v205_v11  ;;  %v260_v20 = vadd.f32 %v259_v18, %v206_v12 }
 0x15b   :  { %264 = vst [vmem:[#allocation9 + $0x10] sm:$0xff] %v237_v19 }
 0x15c   :  { %265 = vst [vmem:[#allocation9 + $0x18] sm:$0xff] %v260_v20 }
 0x15d   :  { %278 = dma.vmem_to_hbm [thread:$0]  %s271_s16, 512, %s273_s28, [#allocation8], %s652_s24, %s652_s24, %s653_s25  }
 0x15e   :  { %640 = dma.done.wait [#allocation8], 512  }
 0x15f   :  { %641 = vsyncadd [#allocation8], 4294966784 }
 0x160   :  { %283 = vsyncpa [#allocation7], 1 }
 0x161   :  { %284 = vsyncpa [#allocation8], 1 }
 0x162   :  { %285 = vsyncmov [#allocation3] }
 0x165   :  { %s286_s3 = vpop.sfrf %285 }
 0x166   :  { %p344_p12 = scmp.ne.s32.totalorder %s286_s3, 0 }
 0x168   :  { %290 = shalt.err (%p344_p12)  }

</bundles_post_ra>
